<compile_context>
chip_gen: v6e
topology: v6e:2x2x1
jax: 0.10.0
libtpu: 0.0.40
codegen_flags: <defaults>
</compile_context>

<pallas_src>
import functools

import jax
import jax.numpy as jnp
from jax import lax
from jax.experimental import pallas as pl
from jax.experimental.pallas import tpu as pltpu

EPS = 1e-5


def _resnet_block_kernel(row_ref, col_ref, x_ref,
                         w1_ref, g1_ref, be1_ref,
                         w2_ref, g2_ref, be2_ref,
                         o_ref, *, H, W, matmul_dtype):
    Cp, M = x_ref.shape            # (padded channels, N*H*W); lanes = M
    inv_m = 1.0 / M

    x = x_ref[...]                 # lane-dense input == residual identity
    row = row_ref[...]             # (1, M) int32 spatial y of every lane
    col = col_ref[...]             # (1, M) int32 spatial x of every lane

    # Edge-validity masks for the 3x3 taps (zero-padding semantics), built once.
    top_ok = row >= 1              # reading from y-1 stays in-bounds
    bot_ok = row <= H - 2          # reading from y+1 stays in-bounds
    lft_ok = col >= 1
    rgt_ok = col <= W - 2

    def shifted(a, dy, dx):
        # `a` sampled at spatial offset (dy, dx); zero outside the image.
        off = dy * W + dx
        v = a if off == 0 else pltpu.roll(a, shift=(-off) % M, axis=1)
        mask = None
        if dy == -1:
            mask = top_ok
        elif dy == 1:
            mask = bot_ok
        if dx == -1:
            mask = lft_ok if mask is None else mask & lft_ok
        elif dx == 1:
            mask = rgt_ok if mask is None else mask & rgt_ok
        return v if mask is None else jnp.where(mask, v, 0.0)

    def conv3x3(a, w_ref):
        # im2col: a single (Cp, 9*Cp) x (9*Cp, M) MXU matmul (no bias: it is
        # mathematically cancelled by the following batch-norm).
        patches = jnp.concatenate(
            [shifted(a, dy, dx) for dy in (-1, 0, 1) for dx in (-1, 0, 1)],
            axis=0)
        return jnp.dot(w_ref[...].astype(matmul_dtype),
                       patches.astype(matmul_dtype),
                       preferred_element_type=jnp.float32)

    def batchnorm(y, g_ref, b_ref):
        # Per-channel batch statistics over all N*H*W lanes (biased variance).
        mean = jnp.sum(y, axis=1, keepdims=True) * inv_m
        cen = y - mean
        var = jnp.sum(cen * cen, axis=1, keepdims=True) * inv_m
        return cen * (lax.rsqrt(var + EPS) * g_ref[...]) + b_ref[...]

    out1 = jnp.maximum(batchnorm(conv3x3(x, w1_ref), g1_ref, be1_ref), 0.0)
    out2 = batchnorm(conv3x3(out1, w2_ref), g2_ref, be2_ref)
    o_ref[...] = jnp.maximum(out2 + x, 0.0)


def resnet_block(x_nchw, params, *, matmul_dtype=jnp.float32):
    """x_nchw: (N, C, H, W) float32; params in PyTorch layouts.

    matmul_dtype=jnp.bfloat16 is preferable on v6e/v7x for large channel
    counts (f32 accumulation is kept either way); the default stays f32 so the
    tiny demo matches the f32 reference to 1e-4.
    """
    w1, b1, g1, be1, w2, b2, g2, be2 = params
    del b1, b2  # conv bias is exactly cancelled by training-mode BN
    N, C, H, W = x_nchw.shape
    M = N * H * W
    Cp = ((C + 7) // 8) * 8        # pad channels up to a full sublane group

    # NCHW -> lane-dense (Cp, N*H*W) slab (layout glue).
    x_cm = jnp.pad(
        jnp.transpose(x_nchw.astype(jnp.float32), (1, 0, 2, 3)).reshape(C, M),
        ((0, Cp - C), (0, 0)))

    def weight_mat(w):
        # torch (Cout, Cin, kh, kw) -> im2col matrix (Cp, 9*Cp); column order
        # (ky, kx, cin) matches the patch-row order built in the kernel.
        wp = jnp.zeros((Cp, Cp, 3, 3), jnp.float32).at[:C, :C].set(
            w.astype(jnp.float32))
        return jnp.transpose(wp, (0, 2, 3, 1)).reshape(Cp, 9 * Cp)

    def bn_param(p, fill):
        return jnp.pad(p.astype(jnp.float32).reshape(C, 1),
                       ((0, Cp - C), (0, 0)), constant_values=fill)

    # Static spatial coordinates of every lane (for the conv edge masks).
    sp = jnp.arange(H * W, dtype=jnp.int32)
    row = jnp.tile(sp // W, N).reshape(1, M)
    col = jnp.tile(sp % W, N).reshape(1, M)

    args = (row, col, x_cm,
            weight_mat(w1), bn_param(g1, 1.0), bn_param(be1, 0.0),
            weight_mat(w2), bn_param(g2, 1.0), bn_param(be2, 0.0))

    kernel = functools.partial(_resnet_block_kernel, H=H, W=W,
                               matmul_dtype=matmul_dtype)

    out_cm = pl.pallas_call(
        kernel,
        out_shape=jax.ShapeDtypeStruct((Cp, M), jnp.float32),
        grid=(1,),
        in_specs=[pl.BlockSpec(a.shape, lambda i: (0, 0)) for a in args],
        out_specs=pl.BlockSpec((Cp, M), lambda i: (0, 0)),
        compiler_params=pltpu.CompilerParams(
            dimension_semantics=("arbitrary",)),
    )(*args)

    # (Cp, N*H*W) -> NCHW, dropping the padded channels.
    return jnp.transpose(out_cm[:C].reshape(C, N, H, W), (1, 0, 2, 3))


def resnet_block_reference(x, params):
    """Pure-JAX (XLA) reference of the PyTorch forward, NCHW."""
    w1, b1, g1, be1, w2, b2, g2, be2 = params

    def conv(x, w, b):
        y = lax.conv_general_dilated(
            x, w, window_strides=(1, 1), padding="SAME",
            dimension_numbers=("NCHW", "OIHW", "NCHW"))
        return y + b.reshape(1, -1, 1, 1)

    def bn(x, g, be):
        mean = jnp.mean(x, axis=(0, 2, 3), keepdims=True)
        var = jnp.mean((x - mean) ** 2, axis=(0, 2, 3), keepdims=True)
        return ((x - mean) * lax.rsqrt(var + EPS) * g.reshape(1, -1, 1, 1)
                + be.reshape(1, -1, 1, 1))

    out = jax.nn.relu(bn(conv(x, w1, b1), g1, be1))
    out = bn(conv(out, w2, b2), g2, be2)
    return jax.nn.relu(out + x)


if __name__ == "__main__":
    N, C, H, W = 2, 4, 16, 16
    key = jax.random.PRNGKey(0)
    kx, kw1, kb1, kw2, kb2 = jax.random.split(key, 5)

    x = jax.random.normal(kx, (N, C, H, W), dtype=jnp.float32)

    # Deterministic parameter init (synthetic; PyTorch-like shapes/defaults).
    w1 = jax.random.normal(kw1, (C, C, 3, 3), dtype=jnp.float32) * 0.1
    b1 = jax.random.normal(kb1, (C,), dtype=jnp.float32) * 0.1
    w2 = jax.random.normal(kw2, (C, C, 3, 3), dtype=jnp.float32) * 0.1
    b2 = jax.random.normal(kb2, (C,), dtype=jnp.float32) * 0.1
    g1 = jnp.ones((C,), jnp.float32)    # BatchNorm weight default = 1
    be1 = jnp.zeros((C,), jnp.float32)  # BatchNorm bias default = 0
    g2 = jnp.ones((C,), jnp.float32)
    be2 = jnp.zeros((C,), jnp.float32)

    params = (w1, b1, g1, be1, w2, b2, g2, be2)

    out = jax.block_until_ready(resnet_block(x, params))
    ref = jax.block_until_ready(resnet_block_reference(x, params))

    assert out.shape == (N, C, H, W), out.shape
    assert jnp.allclose(out, ref, rtol=1e-4, atol=1e-4), (
        float(jnp.max(jnp.abs(out - ref))))
    print("KERNEL_OK")
</pallas_src>

<mosaic_0001>
module attributes {stable_mosaic.version = 11 : i64} {
  func.func @_resnet_block_kernel(%arg0: i32, %arg1: memref<1x512xi32, #tpu.memory_space<vmem>>, %arg2: memref<1x512xi32, #tpu.memory_space<vmem>>, %arg3: memref<8x512xf32, #tpu.memory_space<vmem>>, %arg4: memref<8x72xf32, #tpu.memory_space<vmem>>, %arg5: memref<8x1xf32, #tpu.memory_space<vmem>>, %arg6: memref<8x1xf32, #tpu.memory_space<vmem>>, %arg7: memref<8x72xf32, #tpu.memory_space<vmem>>, %arg8: memref<8x1xf32, #tpu.memory_space<vmem>>, %arg9: memref<8x1xf32, #tpu.memory_space<vmem>>, %arg10: memref<8x512xf32, #tpu.memory_space<vmem>>) attributes {dimension_semantics = [#tpu.dimension_semantics<arbitrary>], iteration_bounds = array<i64: 1>, scalar_prefetch = 0 : i64, scratch_operands = 0 : i64, tpu.core_type = #tpu.core_type<tc>, window_params = [{pipeline_mode = #tpu.pipeline_mode<synchronous>, transform_indices = @transform_0, window_bounds = array<i64: 1, 512>}, {pipeline_mode = #tpu.pipeline_mode<synchronous>, transform_indices = @transform_1, window_bounds = array<i64: 1, 512>}, {pipeline_mode = #tpu.pipeline_mode<synchronous>, transform_indices = @transform_2, window_bounds = array<i64: 8, 512>}, {pipeline_mode = #tpu.pipeline_mode<synchronous>, transform_indices = @transform_3, window_bounds = array<i64: 8, 72>}, {pipeline_mode = #tpu.pipeline_mode<synchronous>, transform_indices = @transform_4, window_bounds = array<i64: 8, 1>}, {pipeline_mode = #tpu.pipeline_mode<synchronous>, transform_indices = @transform_5, window_bounds = array<i64: 8, 1>}, {pipeline_mode = #tpu.pipeline_mode<synchronous>, transform_indices = @transform_6, window_bounds = array<i64: 8, 72>}, {pipeline_mode = #tpu.pipeline_mode<synchronous>, transform_indices = @transform_7, window_bounds = array<i64: 8, 1>}, {pipeline_mode = #tpu.pipeline_mode<synchronous>, transform_indices = @transform_8, window_bounds = array<i64: 8, 1>}, {pipeline_mode = #tpu.pipeline_mode<synchronous>, transform_indices = @transform_9, window_bounds = array<i64: 8, 512>}]} {
    %c0 = arith.constant 0 : index
    %c0_0 = arith.constant 0 : index
    %0 = vector.load %arg3[%c0, %c0_0] : memref<8x512xf32, #tpu.memory_space<vmem>>, vector<8x512xf32>
    %c0_1 = arith.constant 0 : index
    %c0_2 = arith.constant 0 : index
    %1 = vector.load %arg1[%c0_1, %c0_2] : memref<1x512xi32, #tpu.memory_space<vmem>>, vector<1x512xi32>
    %c0_3 = arith.constant 0 : index
    %c0_4 = arith.constant 0 : index
    %2 = vector.load %arg2[%c0_3, %c0_4] : memref<1x512xi32, #tpu.memory_space<vmem>>, vector<1x512xi32>
    %c1_i32 = arith.constant 1 : i32
    %3 = vector.broadcast %c1_i32 : i32 to vector<1x512xi32>
    %4 = arith.cmpi sge, %1, %3 : vector<1x512xi32>
    %c14_i32 = arith.constant 14 : i32
    %5 = vector.broadcast %c14_i32 : i32 to vector<1x512xi32>
    %6 = arith.cmpi sle, %1, %5 : vector<1x512xi32>
    %c1_i32_5 = arith.constant 1 : i32
    %7 = vector.broadcast %c1_i32_5 : i32 to vector<1x512xi32>
    %8 = arith.cmpi sge, %2, %7 : vector<1x512xi32>
    %c14_i32_6 = arith.constant 14 : i32
    %9 = vector.broadcast %c14_i32_6 : i32 to vector<1x512xi32>
    %10 = arith.cmpi sle, %2, %9 : vector<1x512xi32>
    %c17_i32 = arith.constant 17 : i32
    %11 = tpu.dynamic_rotate %0 by %c17_i32 dim 1 : vector<8x512xf32>, i32 -> vector<8x512xf32>
    %12 = arith.andi %4, %8 : vector<1x512xi1>
    %cst = arith.constant 0.000000e+00 : f32
    %13 = vector.shape_cast %12 : vector<1x512xi1> to vector<1x512xi1>
    %14 = vector.broadcast %13 : vector<1x512xi1> to vector<8x512xi1>
    %15 = vector.broadcast %cst : f32 to vector<8x512xf32>
    %16 = arith.select %14, %11, %15 : vector<8x512xi1>, vector<8x512xf32>
    %c16_i32 = arith.constant 16 : i32
    %17 = tpu.dynamic_rotate %0 by %c16_i32 dim 1 : vector<8x512xf32>, i32 -> vector<8x512xf32>
    %cst_7 = arith.constant 0.000000e+00 : f32
    %18 = vector.shape_cast %4 : vector<1x512xi1> to vector<1x512xi1>
    %19 = vector.broadcast %18 : vector<1x512xi1> to vector<8x512xi1>
    %20 = vector.broadcast %cst_7 : f32 to vector<8x512xf32>
    %21 = arith.select %19, %17, %20 : vector<8x512xi1>, vector<8x512xf32>
    %c15_i32 = arith.constant 15 : i32
    %22 = tpu.dynamic_rotate %0 by %c15_i32 dim 1 : vector<8x512xf32>, i32 -> vector<8x512xf32>
    %23 = arith.andi %4, %10 : vector<1x512xi1>
    %cst_8 = arith.constant 0.000000e+00 : f32
    %24 = vector.shape_cast %23 : vector<1x512xi1> to vector<1x512xi1>
    %25 = vector.broadcast %24 : vector<1x512xi1> to vector<8x512xi1>
    %26 = vector.broadcast %cst_8 : f32 to vector<8x512xf32>
    %27 = arith.select %25, %22, %26 : vector<8x512xi1>, vector<8x512xf32>
    %c1_i32_9 = arith.constant 1 : i32
    %28 = tpu.dynamic_rotate %0 by %c1_i32_9 dim 1 : vector<8x512xf32>, i32 -> vector<8x512xf32>
    %cst_10 = arith.constant 0.000000e+00 : f32
    %29 = vector.shape_cast %8 : vector<1x512xi1> to vector<1x512xi1>
    %30 = vector.broadcast %29 : vector<1x512xi1> to vector<8x512xi1>
    %31 = vector.broadcast %cst_10 : f32 to vector<8x512xf32>
    %32 = arith.select %30, %28, %31 : vector<8x512xi1>, vector<8x512xf32>
    %c511_i32 = arith.constant 511 : i32
    %33 = tpu.dynamic_rotate %0 by %c511_i32 dim 1 : vector<8x512xf32>, i32 -> vector<8x512xf32>
    %cst_11 = arith.constant 0.000000e+00 : f32
    %34 = vector.shape_cast %10 : vector<1x512xi1> to vector<1x512xi1>
    %35 = vector.broadcast %34 : vector<1x512xi1> to vector<8x512xi1>
    %36 = vector.broadcast %cst_11 : f32 to vector<8x512xf32>
    %37 = arith.select %35, %33, %36 : vector<8x512xi1>, vector<8x512xf32>
    %c497_i32 = arith.constant 497 : i32
    %38 = tpu.dynamic_rotate %0 by %c497_i32 dim 1 : vector<8x512xf32>, i32 -> vector<8x512xf32>
    %39 = arith.andi %6, %8 : vector<1x512xi1>
    %cst_12 = arith.constant 0.000000e+00 : f32
    %40 = vector.shape_cast %39 : vector<1x512xi1> to vector<1x512xi1>
    %41 = vector.broadcast %40 : vector<1x512xi1> to vector<8x512xi1>
    %42 = vector.broadcast %cst_12 : f32 to vector<8x512xf32>
    %43 = arith.select %41, %38, %42 : vector<8x512xi1>, vector<8x512xf32>
    %c496_i32 = arith.constant 496 : i32
    %44 = tpu.dynamic_rotate %0 by %c496_i32 dim 1 : vector<8x512xf32>, i32 -> vector<8x512xf32>
    %cst_13 = arith.constant 0.000000e+00 : f32
    %45 = vector.shape_cast %6 : vector<1x512xi1> to vector<1x512xi1>
    %46 = vector.broadcast %45 : vector<1x512xi1> to vector<8x512xi1>
    %47 = vector.broadcast %cst_13 : f32 to vector<8x512xf32>
    %48 = arith.select %46, %44, %47 : vector<8x512xi1>, vector<8x512xf32>
    %c495_i32 = arith.constant 495 : i32
    %49 = tpu.dynamic_rotate %0 by %c495_i32 dim 1 : vector<8x512xf32>, i32 -> vector<8x512xf32>
    %50 = arith.andi %6, %10 : vector<1x512xi1>
    %cst_14 = arith.constant 0.000000e+00 : f32
    %51 = vector.shape_cast %50 : vector<1x512xi1> to vector<1x512xi1>
    %52 = vector.broadcast %51 : vector<1x512xi1> to vector<8x512xi1>
    %53 = vector.broadcast %cst_14 : f32 to vector<8x512xf32>
    %54 = arith.select %52, %49, %53 : vector<8x512xi1>, vector<8x512xf32>
    %55 = tpu.concatenate %16, %21, %27, %32, %0, %37, %43, %48, %54 in 0 : vector<8x512xf32>, vector<8x512xf32>, vector<8x512xf32>, vector<8x512xf32>, vector<8x512xf32>, vector<8x512xf32>, vector<8x512xf32>, vector<8x512xf32>, vector<8x512xf32> -> vector<72x512xf32>
    %c0_15 = arith.constant 0 : index
    %c0_16 = arith.constant 0 : index
    %56 = vector.load %arg4[%c0_15, %c0_16] : memref<8x72xf32, #tpu.memory_space<vmem>>, vector<8x72xf32>
    %cst_17 = arith.constant dense<0.000000e+00> : vector<8x512xf32>
    %57 = tpu.matmul %56, %55, %cst_17 {dimension_numbers = #tpu.dot_dimension_numbers<[1], [0], [0], [1], [0, 0, 1, 1], [], []>} : vector<8x72xf32>, vector<72x512xf32>, vector<8x512xf32> -> vector<8x512xf32>
    %cst_18 = arith.constant dense<0.000000e+00> : vector<8xf32>
    %58 = vector.multi_reduction <add>, %57, %cst_18 [1] : vector<8x512xf32> to vector<8xf32>
    %59 = vector.shape_cast %58 : vector<8xf32> to vector<8x1xf32>
    %cst_19 = arith.constant 0.001953125 : f32
    %60 = vector.broadcast %cst_19 : f32 to vector<8x1xf32>
    %61 = arith.mulf %59, %60 : vector<8x1xf32>
    %62 = vector.broadcast %61 : vector<8x1xf32> to vector<8x512xf32>
    %63 = arith.subf %57, %62 : vector<8x512xf32>
    %64 = arith.mulf %63, %63 : vector<8x512xf32>
    %cst_20 = arith.constant dense<0.000000e+00> : vector<8xf32>
    %65 = vector.multi_reduction <add>, %64, %cst_20 [1] : vector<8x512xf32> to vector<8xf32>
    %66 = vector.shape_cast %65 : vector<8xf32> to vector<8x1xf32>
    %cst_21 = arith.constant 0.001953125 : f32
    %67 = vector.broadcast %cst_21 : f32 to vector<8x1xf32>
    %68 = arith.mulf %66, %67 : vector<8x1xf32>
    %cst_22 = arith.constant 9.99999974E-6 : f32
    %69 = vector.broadcast %cst_22 : f32 to vector<8x1xf32>
    %70 = arith.addf %68, %69 : vector<8x1xf32>
    %71 = math.rsqrt %70 : vector<8x1xf32>
    %c0_23 = arith.constant 0 : index
    %c0_24 = arith.constant 0 : index
    %72 = vector.load %arg5[%c0_23, %c0_24] : memref<8x1xf32, #tpu.memory_space<vmem>>, vector<8x1xf32>
    %73 = arith.mulf %71, %72 : vector<8x1xf32>
    %74 = vector.broadcast %73 : vector<8x1xf32> to vector<8x512xf32>
    %75 = arith.mulf %63, %74 : vector<8x512xf32>
    %c0_25 = arith.constant 0 : index
    %c0_26 = arith.constant 0 : index
    %76 = vector.load %arg6[%c0_25, %c0_26] : memref<8x1xf32, #tpu.memory_space<vmem>>, vector<8x1xf32>
    %77 = vector.broadcast %76 : vector<8x1xf32> to vector<8x512xf32>
    %78 = arith.addf %75, %77 : vector<8x512xf32>
    %cst_27 = arith.constant 0.000000e+00 : f32
    %79 = vector.broadcast %cst_27 : f32 to vector<8x512xf32>
    %80 = arith.maximumf %78, %79 : vector<8x512xf32>
    %c17_i32_28 = arith.constant 17 : i32
    %81 = tpu.dynamic_rotate %80 by %c17_i32_28 dim 1 : vector<8x512xf32>, i32 -> vector<8x512xf32>
    %82 = arith.andi %4, %8 : vector<1x512xi1>
    %cst_29 = arith.constant 0.000000e+00 : f32
    %83 = vector.shape_cast %82 : vector<1x512xi1> to vector<1x512xi1>
    %84 = vector.broadcast %83 : vector<1x512xi1> to vector<8x512xi1>
    %85 = vector.broadcast %cst_29 : f32 to vector<8x512xf32>
    %86 = arith.select %84, %81, %85 : vector<8x512xi1>, vector<8x512xf32>
    %c16_i32_30 = arith.constant 16 : i32
    %87 = tpu.dynamic_rotate %80 by %c16_i32_30 dim 1 : vector<8x512xf32>, i32 -> vector<8x512xf32>
    %cst_31 = arith.constant 0.000000e+00 : f32
    %88 = vector.shape_cast %4 : vector<1x512xi1> to vector<1x512xi1>
    %89 = vector.broadcast %88 : vector<1x512xi1> to vector<8x512xi1>
    %90 = vector.broadcast %cst_31 : f32 to vector<8x512xf32>
    %91 = arith.select %89, %87, %90 : vector<8x512xi1>, vector<8x512xf32>
    %c15_i32_32 = arith.constant 15 : i32
    %92 = tpu.dynamic_rotate %80 by %c15_i32_32 dim 1 : vector<8x512xf32>, i32 -> vector<8x512xf32>
    %93 = arith.andi %4, %10 : vector<1x512xi1>
    %cst_33 = arith.constant 0.000000e+00 : f32
    %94 = vector.shape_cast %93 : vector<1x512xi1> to vector<1x512xi1>
    %95 = vector.broadcast %94 : vector<1x512xi1> to vector<8x512xi1>
    %96 = vector.broadcast %cst_33 : f32 to vector<8x512xf32>
    %97 = arith.select %95, %92, %96 : vector<8x512xi1>, vector<8x512xf32>
    %c1_i32_34 = arith.constant 1 : i32
    %98 = tpu.dynamic_rotate %80 by %c1_i32_34 dim 1 : vector<8x512xf32>, i32 -> vector<8x512xf32>
    %cst_35 = arith.constant 0.000000e+00 : f32
    %99 = vector.shape_cast %8 : vector<1x512xi1> to vector<1x512xi1>
    %100 = vector.broadcast %99 : vector<1x512xi1> to vector<8x512xi1>
    %101 = vector.broadcast %cst_35 : f32 to vector<8x512xf32>
    %102 = arith.select %100, %98, %101 : vector<8x512xi1>, vector<8x512xf32>
    %c511_i32_36 = arith.constant 511 : i32
    %103 = tpu.dynamic_rotate %80 by %c511_i32_36 dim 1 : vector<8x512xf32>, i32 -> vector<8x512xf32>
    %cst_37 = arith.constant 0.000000e+00 : f32
    %104 = vector.shape_cast %10 : vector<1x512xi1> to vector<1x512xi1>
    %105 = vector.broadcast %104 : vector<1x512xi1> to vector<8x512xi1>
    %106 = vector.broadcast %cst_37 : f32 to vector<8x512xf32>
    %107 = arith.select %105, %103, %106 : vector<8x512xi1>, vector<8x512xf32>
    %c497_i32_38 = arith.constant 497 : i32
    %108 = tpu.dynamic_rotate %80 by %c497_i32_38 dim 1 : vector<8x512xf32>, i32 -> vector<8x512xf32>
    %109 = arith.andi %6, %8 : vector<1x512xi1>
    %cst_39 = arith.constant 0.000000e+00 : f32
    %110 = vector.shape_cast %109 : vector<1x512xi1> to vector<1x512xi1>
    %111 = vector.broadcast %110 : vector<1x512xi1> to vector<8x512xi1>
    %112 = vector.broadcast %cst_39 : f32 to vector<8x512xf32>
    %113 = arith.select %111, %108, %112 : vector<8x512xi1>, vector<8x512xf32>
    %c496_i32_40 = arith.constant 496 : i32
    %114 = tpu.dynamic_rotate %80 by %c496_i32_40 dim 1 : vector<8x512xf32>, i32 -> vector<8x512xf32>
    %cst_41 = arith.constant 0.000000e+00 : f32
    %115 = vector.shape_cast %6 : vector<1x512xi1> to vector<1x512xi1>
    %116 = vector.broadcast %115 : vector<1x512xi1> to vector<8x512xi1>
    %117 = vector.broadcast %cst_41 : f32 to vector<8x512xf32>
    %118 = arith.select %116, %114, %117 : vector<8x512xi1>, vector<8x512xf32>
    %c495_i32_42 = arith.constant 495 : i32
    %119 = tpu.dynamic_rotate %80 by %c495_i32_42 dim 1 : vector<8x512xf32>, i32 -> vector<8x512xf32>
    %120 = arith.andi %6, %10 : vector<1x512xi1>
    %cst_43 = arith.constant 0.000000e+00 : f32
    %121 = vector.shape_cast %120 : vector<1x512xi1> to vector<1x512xi1>
    %122 = vector.broadcast %121 : vector<1x512xi1> to vector<8x512xi1>
    %123 = vector.broadcast %cst_43 : f32 to vector<8x512xf32>
    %124 = arith.select %122, %119, %123 : vector<8x512xi1>, vector<8x512xf32>
    %125 = tpu.concatenate %86, %91, %97, %102, %80, %107, %113, %118, %124 in 0 : vector<8x512xf32>, vector<8x512xf32>, vector<8x512xf32>, vector<8x512xf32>, vector<8x512xf32>, vector<8x512xf32>, vector<8x512xf32>, vector<8x512xf32>, vector<8x512xf32> -> vector<72x512xf32>
    %c0_44 = arith.constant 0 : index
    %c0_45 = arith.constant 0 : index
    %126 = vector.load %arg7[%c0_44, %c0_45] : memref<8x72xf32, #tpu.memory_space<vmem>>, vector<8x72xf32>
    %cst_46 = arith.constant dense<0.000000e+00> : vector<8x512xf32>
    %127 = tpu.matmul %126, %125, %cst_46 {dimension_numbers = #tpu.dot_dimension_numbers<[1], [0], [0], [1], [0, 0, 1, 1], [], []>} : vector<8x72xf32>, vector<72x512xf32>, vector<8x512xf32> -> vector<8x512xf32>
    %cst_47 = arith.constant dense<0.000000e+00> : vector<8xf32>
    %128 = vector.multi_reduction <add>, %127, %cst_47 [1] : vector<8x512xf32> to vector<8xf32>
    %129 = vector.shape_cast %128 : vector<8xf32> to vector<8x1xf32>
    %cst_48 = arith.constant 0.001953125 : f32
    %130 = vector.broadcast %cst_48 : f32 to vector<8x1xf32>
    %131 = arith.mulf %129, %130 : vector<8x1xf32>
    %132 = vector.broadcast %131 : vector<8x1xf32> to vector<8x512xf32>
    %133 = arith.subf %127, %132 : vector<8x512xf32>
    %134 = arith.mulf %133, %133 : vector<8x512xf32>
    %cst_49 = arith.constant dense<0.000000e+00> : vector<8xf32>
    %135 = vector.multi_reduction <add>, %134, %cst_49 [1] : vector<8x512xf32> to vector<8xf32>
    %136 = vector.shape_cast %135 : vector<8xf32> to vector<8x1xf32>
    %cst_50 = arith.constant 0.001953125 : f32
    %137 = vector.broadcast %cst_50 : f32 to vector<8x1xf32>
    %138 = arith.mulf %136, %137 : vector<8x1xf32>
    %cst_51 = arith.constant 9.99999974E-6 : f32
    %139 = vector.broadcast %cst_51 : f32 to vector<8x1xf32>
    %140 = arith.addf %138, %139 : vector<8x1xf32>
    %141 = math.rsqrt %140 : vector<8x1xf32>
    %c0_52 = arith.constant 0 : index
    %c0_53 = arith.constant 0 : index
    %142 = vector.load %arg8[%c0_52, %c0_53] : memref<8x1xf32, #tpu.memory_space<vmem>>, vector<8x1xf32>
    %143 = arith.mulf %141, %142 : vector<8x1xf32>
    %144 = vector.broadcast %143 : vector<8x1xf32> to vector<8x512xf32>
    %145 = arith.mulf %133, %144 : vector<8x512xf32>
    %c0_54 = arith.constant 0 : index
    %c0_55 = arith.constant 0 : index
    %146 = vector.load %arg9[%c0_54, %c0_55] : memref<8x1xf32, #tpu.memory_space<vmem>>, vector<8x1xf32>
    %147 = vector.broadcast %146 : vector<8x1xf32> to vector<8x512xf32>
    %148 = arith.addf %145, %147 : vector<8x512xf32>
    %149 = arith.addf %148, %0 : vector<8x512xf32>
    %cst_56 = arith.constant 0.000000e+00 : f32
    %150 = vector.broadcast %cst_56 : f32 to vector<8x512xf32>
    %151 = arith.maximumf %149, %150 : vector<8x512xf32>
    %c0_57 = arith.constant 0 : index
    %c0_58 = arith.constant 0 : index
    %152 = vector.load %arg10[%c0_57, %c0_58] : memref<8x512xf32, #tpu.memory_space<vmem>>, vector<8x512xf32>
    tpu.vector_store %arg10[%c0_57, %c0_58], %151 {strides = array<i32>} : memref<8x512xf32, #tpu.memory_space<vmem>>, vector<8x512xf32>,
    return
  }
  func.func @transform_0(%arg0: i32) -> (i32, i32) {
    %c0_i32 = arith.constant 0 : i32
    %c0_i32_0 = arith.constant 0 : i32
    %c0_i32_1 = arith.constant 0 : i32
    return %c0_i32, %c0_i32_0 : i32, i32
  }
  func.func @transform_1(%arg0: i32) -> (i32, i32) {
    %c0_i32 = arith.constant 0 : i32
    %c0_i32_0 = arith.constant 0 : i32
    %c0_i32_1 = arith.constant 0 : i32
    return %c0_i32, %c0_i32_0 : i32, i32
  }
  func.func @transform_2(%arg0: i32) -> (i32, i32) {
    %c0_i32 = arith.constant 0 : i32
    %c0_i32_0 = arith.constant 0 : i32
    %c0_i32_1 = arith.constant 0 : i32
    return %c0_i32, %c0_i32_0 : i32, i32
  }
  func.func @transform_3(%arg0: i32) -> (i32, i32) {
    %c0_i32 = arith.constant 0 : i32
    %c0_i32_0 = arith.constant 0 : i32
    %c0_i32_1 = arith.constant 0 : i32
    return %c0_i32, %c0_i32_0 : i32, i32
  }
  func.func @transform_4(%arg0: i32) -> (i32, i32) {
    %c0_i32 = arith.constant 0 : i32
    %c0_i32_0 = arith.constant 0 : i32
    %c0_i32_1 = arith.constant 0 : i32
    return %c0_i32, %c0_i32_0 : i32, i32
  }
  func.func @transform_5(%arg0: i32) -> (i32, i32) {
    %c0_i32 = arith.constant 0 : i32
    %c0_i32_0 = arith.constant 0 : i32
    %c0_i32_1 = arith.constant 0 : i32
    return %c0_i32, %c0_i32_0 : i32, i32
  }
  func.func @transform_6(%arg0: i32) -> (i32, i32) {
    %c0_i32 = arith.constant 0 : i32
    %c0_i32_0 = arith.constant 0 : i32
    %c0_i32_1 = arith.constant 0 : i32
    return %c0_i32, %c0_i32_0 : i32, i32
  }
  func.func @transform_7(%arg0: i32) -> (i32, i32) {
    %c0_i32 = arith.constant 0 : i32
    %c0_i32_0 = arith.constant 0 : i32
    %c0_i32_1 = arith.constant 0 : i32
    return %c0_i32, %c0_i32_0 : i32, i32
  }
  func.func @transform_8(%arg0: i32) -> (i32, i32) {
    %c0_i32 = arith.constant 0 : i32
    %c0_i32_0 = arith.constant 0 : i32
    %c0_i32_1 = arith.constant 0 : i32
    return %c0_i32, %c0_i32_0 : i32, i32
  }
  func.func @transform_9(%arg0: i32) -> (i32, i32) {
    %c0_i32 = arith.constant 0 : i32
    %c0_i32_0 = arith.constant 0 : i32
    %c0_i32_1 = arith.constant 0 : i32
    return %c0_i32, %c0_i32_0 : i32, i32
  }
}

</mosaic_0001>

<bundles_post_ra>
// kernel: tpu_custom_call.1
= control target key start
LH: loop header
LB: loop body
LE: loop exit
PB: predicated region body
PF: predicated region fallthrough
CT: control target
= control target key end

     0   :  { %14 = vsyncpa [#allocation3], 0  ;;  %s1862_s0 = inlined_call_operand.hbm [shape: s32[1,512], index: 0, kind: input, shape index: {}]   ;;  %s1863_s1 = inlined_call_operand.hbm [shape: s32[1,512], index: 1, kind: input, shape index: {}]   ;;  %s1864_s2 = inlined_call_operand.vmem [shape: f32[8,512], index: 2, kind: input, shape index: {}]   ;;  %s1865_s3 = inlined_call_operand.vmem [shape: f32[8,72], index: 3, kind: input, shape index: {}]   ;;  %s1866_s4 = inlined_call_operand.vmem [shape: f32[8,1], index: 4, kind: input, shape index: {}]   ;;  %s1867_s5 = inlined_call_operand.vmem [shape: f32[8,1], index: 5, kind: input, shape index: {}]   ;;  %s1868_s6 = inlined_call_operand.hbm [shape: f32[8,72], index: 6, kind: input, shape index: {}]   ;;  %s1869_s7 = inlined_call_operand.vmem [shape: f32[8,1], index: 7, kind: input, shape index: {}]   ;;  %s1870_s8 = inlined_call_operand.vmem [shape: f32[8,1], index: 8, kind: input, shape index: {}]   ;;  %s1871_s9 = inlined_call_operand.hbm [shape: f32[8,512], index: 9, kind: output, shape index: {}]  }
   0x1   :  { %15 = vsyncpa [#allocation6], 0 }
   0x2   :  { %16 = vsyncpa [#allocation4], 0  ;;  %s1101_s30 = smov [#allocation5]   ;;  %s1102_s11 = smov [#allocation2]  }
   0x3   :  { %s33_s10 = sshll.u32 %s1101_s30, 4  ;;  %s23_s12 = sshll.u32 %s1102_s11, 4  ;;  %s34_s10 = int_to_ptr.vmem [resolvable:$true] %s33_s10  ;;  %s24_s12 = int_to_ptr.vmem [resolvable:$true] %s23_s12 }
   0x4   :  { %s1023_s13 = scalar_lea.vmem %s34_s10, 64  ;;  %p1028_p1 = scmp.lt.s32.totalorder %s34_s10, %s34_s10 }
   0x5   :  { %p1024_p0 = scmp.ne.s32.totalorder %s34_s10, %s1023_s13  ;;  %p1029_p2 = scmp.lt.s32.totalorder %s1023_s13, %s1023_s13 }
   0x7   :  { %p1030_p3 = por %p1029_p2, %p1028_p1 }
   0x9   :  { %p1031_p4 = pnand %p1030_p3, %p1024_p0 }
   0xb   :  { %1034 = shalt.err (!%p1031_p4)
}
   0xc   :  { %36 = dma.hbm_to_vmem [thread:$0]  %s1863_s1, 64, %s34_s10, [#allocation6]  }
   0xd   :  { %s1043_s16 = scalar_lea.vmem %s24_s12, 64  ;;  %p1048_p6 = scmp.lt.s32.totalorder %s24_s12, %s24_s12 }
   0xe   :  { %p1044_p5 = scmp.ne.s32.totalorder %s24_s12, %s1043_s16  ;;  %p1049_p7 = scmp.lt.s32.totalorder %s1043_s16, %s1043_s16 }
  0x10   :  { %p1050_p8 = por %p1049_p7, %p1048_p6 }
  0x12   :  { %p1051_p9 = pnand %p1050_p8, %p1044_p5 }
  0x14   :  { %1054 = shalt.err (!%p1051_p9)
}
  0x15   :  { %26 = dma.hbm_to_vmem [thread:$0]  %s1862_s0, 64, %s24_s12, [#allocation3]  }
  0x16   :  { %s1103_s19 = smov [#allocation7]  }
  0x17   :  { %s51_s20 = sshll.u32 %s1103_s19, 4  ;;  %s52_s20 = int_to_ptr.vmem [resolvable:$true] %s51_s20 }
  0x18   :  { %s1063_s21 = scalar_lea.vmem %s52_s20, 128  ;;  %p1068_p11 = scmp.lt.s32.totalorder %s52_s20, %s52_s20 }
  0x19   :  { %p1064_p10 = scmp.ne.s32.totalorder %s52_s20, %s1063_s21  ;;  %p1069_p12 = scmp.lt.s32.totalorder %s1063_s21, %s1063_s21 }
  0x1b   :  { %p1070_p13 = por %p1069_p12, %p1068_p11 }
  0x1d   :  { %p1071_p0 = pnand %p1070_p13, %p1064_p10 }
  0x1f   :  { %1074 = shalt.err (!%p1071_p0)
}
  0x20   :  { %54 = dma.hbm_to_vmem [thread:$0]  %s1868_s6, 128, %s52_s20, [#allocation6]  }
  0x21   :  { %1095 = dma.done.wait [#allocation3], 64  }
  0x22   :  { %1096 = vsyncadd [#allocation3], 4294967232 }
  0x23   :  { %1097 = dma.done.wait [#allocation6], 192  }
  0x24   :  { %1098 = vsyncadd [#allocation6], 4294967104  ;;  %v1104_v0 = vmov 0   ;;  %v1179_v1 = vld [vmem:[%s1864_s2 + $0x8] sm:$0xff]  ;;  %v1184_v2 = vld [vmem:[%s1864_s2] sm:$0xff]  ;;  %s1105_s6 = smov 111   ;;  %v86_v8 = vlaneseq }
  0x25   :  { %1009 = vset.pattern.permute.xlu0 %v1104_v0  ;;  %1010 = vset.pattern.permute.xlu1 %v1104_v0  ;;  %v1193_v3 = vld [vmem:[%s1864_s2 + $0x10] sm:$0xff]  ;;  %s1106_s28 = smov 112   ;;  %s1107_s29 = smov 113   ;;  %v1210_v4 = vld [vmem:[%s1864_s2 + $0x18] sm:$0xff]  ;;  %v1112_v5 = vmov 0.0   ;;  %v1911_v37 = vmov 0 }
  0x26   :  { %351 = vrot.lane.b32.xlu0 %v1179_v1, %s1105_s6  ;;  %349 = vrot.lane.b32.xlu1 %v1184_v2, %s1105_s6  ;;  %s1108_s11 = smov 127   ;;  %s1109_s2 = smov 1   ;;  %v1262_v6 = vld [vmem:[#allocation2] sm:$0xf]  ;;  %v1264_v7 = vld [vmem:[#allocation5] sm:$0xf] }
  0x27   :  { %s1110_s12 = smov 15   ;;  %s1111_s13 = smov 16   ;;  %457 = vmatprep.mubr.f32.mxu0 %v1112_v5  ;;  %528 = vmatprep.mubr.f32.mxu1 %v1112_v5  ;;  %vm75_vm0 = vcmp.le.s32.totalorder %v1262_v6, 14  ;;  %vm1873_vm1 = vcmp.le.s32.totalorder %v1264_v7, 14  ;;  %v96_v9 = vshrl.u32 %v86_v8, 7  ;;  %vm1875_vm3 = vcmp.ge.s32.totalorder %v1264_v7, 1 }
  0x28   :  { %s1113_s14 = smov 17   ;;  %vm362_vm2 = vmand %vm75_vm0, %vm1873_vm1  ;;  %v1276_v13 = vand.u32 127, %v86_v8  ;;  %v324_v18 = vsel %vm75_vm0, 1, %v1104_v0  ;;  %v247_v43 = vsel %vm1873_vm1, 1, %v1104_v0  ;;  %v1913_v45 = vmov 0 }
  0x29   :  { %v1270_v10 = vsub.s32 1, %v96_v9  ;;  %v363_v11 = vsel %vm362_vm2, 1, %v1104_v0  ;;  %v1273_v12 = vsub.s32 0, %v96_v9  ;;  %vm285_vm4 = vmand %vm75_vm0, %vm1875_vm3  ;;  %v1312_v30 = vsub.s32 3, %v96_v9 }
  0x2a   :  { %353 = vrot.lane.b32.xlu0 %v1193_v3, %s1105_s6  ;;  %313 = vrot.lane.b32.xlu1 %v1179_v1, %s1106_s28  ;;  %vm1872_vm5 = vcmp.lt.s32.totalorder %v1276_v13, 111  ;;  %v1295_v25 = vsel %vm285_vm4, 1, %v1104_v0  ;;  %vm1876_vm8 = vcmp.lt.s32.totalorder %v1276_v13, 112  ;;  %v1318_v34 = vsub.s32 2, %v96_v9 }
  0x2b   :  { %v371_v14 = vrot.slane %v363_v11, %v1270_v10  ;;  %v367_v17 = vrot.slane %v363_v11, %v1273_v12  ;;  %v332_v20 = vrot.slane %v324_v18, %v1270_v10  ;;  %v328_v24 = vrot.slane %v324_v18, %v1273_v12 }
  0x2c   :  { %v294_v29 = vrot.slane %v1295_v25, %v1270_v10  ;;  %vm1874_vm11 = vcmp.lt.s32.totalorder %v1276_v13, 113  ;;  %v290_v38 = vrot.slane %v1295_v25, %v1273_v12  ;;  %v379_v39 = vrot.slane %v363_v11, %v1312_v30 }
  0x2d   :  { %vm1284_vm6 = vcmp.eq.s32.totalorder %v371_v14, 1  ;;  %vm1289_vm7 = vcmp.eq.s32.totalorder %v367_v17, 1  ;;  %vm1306_vm9 = vcmp.eq.s32.totalorder %v332_v20, 1  ;;  %vm1314_vm10 = vcmp.eq.s32.totalorder %v328_v24, 1 }
  0x2e   :  { %315 = vrot.lane.b32.xlu0 %v1193_v3, %s1106_s28  ;;  %311 = vrot.lane.b32.xlu1 %v1184_v2, %s1106_s28  ;;  %vm1329_vm12 = vcmp.eq.s32.totalorder %v294_v29, 1  ;;  %v375_v42 = vrot.slane %v363_v11, %v1318_v34  ;;  %vm1344_vm13 = vcmp.eq.s32.totalorder %v290_v38, 1  ;;  %vm1348_vm14 = vcmp.eq.s32.totalorder %v379_v39, 1 }
  0x2f   :  { %v1912_v37 = vsel %vm1329_vm12, 4294967295, %v1911_v37  ;;  %v1914_v45 = vsel %vm1344_vm13, 4294967295, %v1913_v45  ;;  %v255_v47 = vrot.slane %v247_v43, %v1270_v10  ;;  %vm1877_vm0 = vcmp.lt.s32.totalorder %v1276_v13, 127 }
  0x30   :  { %vm1353_vm15 = vcmp.eq.s32.totalorder %v375_v42, 1  ;;  %v1919_v54 = vmov 0  ;;  %v251_v55 = vrot.slane %v247_v43, %v1273_v12  ;;  %v340_v56 = vrot.slane %v324_v18, %v1312_v30 }
  0x31   :  { %vm1370_vm2 = vcmp.eq.s32.totalorder %v255_v47, 1  ;;  %v336_v59 = vrot.slane %v324_v18, %v1318_v34  ;;  %v1921_v61 = vmov 0  ;;  %v302_v63 = vrot.slane %v1295_v25, %v1312_v30 }
  0x32   :  { %274 = vrot.lane.b32.xlu0 %v1179_v1, %s1107_s29  ;;  %276 = vrot.lane.b32.xlu1 %v1193_v3, %s1107_s29  ;;  %v1920_v54 = vsel %vm1370_vm2, 4294967295, %v1919_v54  ;;  %vm1381_vm4 = vcmp.eq.s32.totalorder %v251_v55, 1  ;;  %v1925_v11 = vmov 0  ;;  %v298_v14 = vrot.slane %v1295_v25, %v1318_v34 }
  0x33   :  { %v1922_v61 = vsel %vm1381_vm4, 4294967295, %v1921_v61  ;;  %vm1391_vm1 = vcmp.eq.s32.totalorder %v336_v59, 1  ;;  %v1943_v47 = vmov 0 }
  0x34   :  { %v1926_v11 = vsel %vm1391_vm1, 4294967295, %v1925_v11 }
  0x36   :  { %355 = vrot.lane.b32.xlu0 %v1210_v4, %s1105_s6  ;;  %272 = vrot.lane.b32.xlu1 %v1184_v2, %s1107_s29 }
  0x3a   :  { %236 = vrot.lane.b32.xlu0 %v1179_v1, %s1108_s11  ;;  %238 = vrot.lane.b32.xlu1 %v1193_v3, %s1108_s11 }
  0x3e   :  { %317 = vrot.lane.b32.xlu0 %v1210_v4, %s1106_s28  ;;  %234 = vrot.lane.b32.xlu1 %v1184_v2, %s1108_s11 }
  0x42   :  { %278 = vrot.lane.b32.xlu0 %v1210_v4, %s1107_s29  ;;  %196 = vrot.lane.b32.xlu1 %v1184_v2, %s1109_s2 }
  0x46   :  { %198 = vrot.lane.b32.xlu0 %v1179_v1, %s1109_s2  ;;  %240 = vrot.lane.b32.xlu1 %v1210_v4, %s1108_s11 }
  0x4a   :  { %202 = vrot.lane.b32.xlu0 %v1210_v4, %s1109_s2  ;;  %157 = vrot.lane.b32.xlu1 %v1184_v2, %s1110_s12 }
  0x4e   :  { %159 = vrot.lane.b32.xlu0 %v1179_v1, %s1110_s12  ;;  %163 = vrot.lane.b32.xlu1 %v1210_v4, %s1110_s12 }
  0x52   :  { %119 = vrot.lane.b32.xlu0 %v1184_v2, %s1111_s13  ;;  %121 = vrot.lane.b32.xlu1 %v1179_v1, %s1111_s13 }
  0x56   :  { %200 = vrot.lane.b32.xlu0 %v1193_v3, %s1109_s2  ;;  %125 = vrot.lane.b32.xlu1 %v1210_v4, %s1111_s13 }
  0x5a   :  { %78 = vrot.lane.b32.xlu0 %v1184_v2, %s1113_s14  ;;  %80 = vrot.lane.b32.xlu1 %v1179_v1, %s1113_s14 }
  0x5e   :  { %161 = vrot.lane.b32.xlu0 %v1193_v3, %s1110_s12  ;;  %84 = vrot.lane.b32.xlu1 %v1210_v4, %s1113_s14 }
  0x62   :  { %123 = vrot.lane.b32.xlu0 %v1193_v3, %s1111_s13  ;;  %82 = vrot.lane.b32.xlu1 %v1193_v3, %s1113_s14 }
  0x98   :  { %v352_v15 = vpop.permute.xlu0 %351  ;;  %v350_v16 = vpop.permute.xlu1 %349 }
  0x99   :  { %v360_v27 = vsel %vm1872_vm5, %v350_v16, %v352_v15 }
  0x9c   :  { %v354_v21 = vpop.permute.xlu0 %353  ;;  %v314_v22 = vpop.permute.xlu1 %313 }
  0x9d   :  { %v359_v26 = vsel %vm1872_vm5, %v352_v15, %v354_v21  ;;  %v1400_v15 = vsel %vm1875_vm3, 1, %v1104_v0  ;;  %vm1415_vm3 = vcmp.eq.s32.totalorder %v302_v63, 1 }
  0x9e   :  { %927 = vmatprep.subr.msk.mxu0 %vm1284_vm6, %v359_v26  ;;  %v1929_v26 = vmov 0 }
  0x9f   :  { %928 = vmatpush1.msk.msra.mxu0 %vm1289_vm7, %v360_v27  ;;  %v259_v27 = vrot.slane %v247_v43, %v1318_v34 }
  0xa0   :  { %v316_v31 = vpop.permute.xlu0 %315  ;;  %v312_v32 = vpop.permute.xlu1 %311 }
  0xa1   :  { %v321_v35 = vsel %vm1876_vm8, %v314_v22, %v316_v31  ;;  %v322_v36 = vsel %vm1876_vm8, %v312_v32, %v314_v22  ;;  %v263_v22 = vrot.slane %v247_v43, %v1312_v30 }
  0xa2   :  { %929 = vmatprep.subr.msk.mxu0 %vm1306_vm9, %v321_v35  ;;  %v1937_v35 = vmov 0 }
  0xa3   :  { %930 = vmatpush1.msk.msra.mxu0 %vm1314_vm10, %v322_v36  ;;  %v213_v36 = vrot.slane %v1400_v15, %v1273_v12 }
  0xa4   :  { %v275_v40 = vpop.permute.xlu0 %274  ;;  %v277_v41 = vpop.permute.xlu1 %276 }
  0xa5   :  { %v282_v44 = vsel %vm1874_vm11, %v275_v40, %v277_v41 }
  0xa6   :  { %931 = vmatprep.subr.msk.mxu0 %vm1329_vm12, %v282_v44  ;;  %vm1884_vm12 = vcmp.lt.s32.totalorder %v1276_v13, 1 }
  0xa8   :  { %v356_v48 = vpop.permute.xlu0 %355  ;;  %v273_v49 = vpop.permute.xlu1 %272 }
  0xa9   :  { %v283_v51 = vsel %vm1874_vm11, %v273_v49, %v275_v40  ;;  %v361_v52 = vsel %vm1872_vm5, %v356_v48, %v350_v16  ;;  %v358_v53 = vsel %vm1872_vm5, %v354_v21, %v356_v48  ;;  %vm1385_vm5 = vcmp.eq.s32.totalorder %v340_v56, 1 }
  0xaa   :  { %932 = vmatpush1.msk.msra.mxu0 %vm1344_vm13, %v283_v51  ;;  %944 = vmatprep.subr.msk.mxu1 %vm1348_vm14, %v361_v52  ;;  %v217_v21 = vrot.slane %v1400_v15, %v1270_v10  ;;  %v1939_v40 = vmov 0  ;;  %v1946_v56 = vmov 0 }
  0xab   :  { %945 = vmatpush1.msk.msra.mxu1 %vm1353_vm15, %v358_v53 }
  0xac   :  { %v237_v57 = vpop.permute.xlu0 %236  ;;  %v239_v58 = vpop.permute.xlu1 %238 }
  0xad   :  { %v244_v60 = vsel %vm1877_vm0, %v237_v57, %v239_v58 }
  0xae   :  { %933 = vmatprep.subr.msk.mxu0 %vm1370_vm2, %v244_v60  ;;  %vm1934_vm2 = vcmp.ge.s32.totalorder %v1262_v6, 1  ;;  %v1948_v60 = vmov 0 }
  0xb0   :  { %v318_v8 = vpop.permute.xlu0 %317  ;;  %v235_v9 = vpop.permute.xlu1 %234 }
  0xb1   :  { %v320_v16 = vsel %vm1876_vm8, %v316_v31, %v318_v8  ;;  %v323_v17 = vsel %vm1876_vm8, %v318_v8, %v312_v32  ;;  %v245_v18 = vsel %vm1877_vm0, %v235_v9, %v237_v57  ;;  %vm1423_vm8 = vcmp.eq.s32.totalorder %v298_v14, 1 }
  0xb2   :  { %934 = vmatpush1.msk.msra.mxu0 %vm1381_vm4, %v245_v18  ;;  %946 = vmatprep.subr.msk.mxu1 %vm1385_vm5, %v323_v17  ;;  %v1930_v26 = vsel %vm1423_vm8, 4294967295, %v1929_v26  ;;  %vm1931_vm0 = vcmp.lt.s32.totalorder %v1276_v13, 113  ;;  %vm1933_vm4 = vcmp.le.s32.totalorder %v1264_v7, 14  ;;  %v1935_v32 = vmov 0 }
  0xb3   :  { %947 = vmatpush1.msk.msra.mxu1 %vm1391_vm1, %v320_v16  ;;  %415 = vmatprep.subr.mxu0 %v1179_v1  ;;  %vm1932_vm11 = vmmov %vm1931_vm0  ;;  %vm1442_vm1 = vcmp.eq.s32.totalorder %v217_v21, 1  ;;  %v221_v17 = vrot.slane %v1400_v15, %v1318_v34 }
  0xb4   :  { %v279_v24 = vpop.permute.xlu0 %278  ;;  %v197_v25 = vpop.permute.xlu1 %196  ;;  %416 = vmatpush1.msra.mxu0 %v1184_v2  ;;  %vm170_vm13 = vmand %vm1934_vm2, %vm1933_vm4  ;;  %v1936_v32 = vsel %vm1442_vm1, 4294967295, %v1935_v32  ;;  %vm1941_vm2 = vcmp.lt.s32.totalorder %v1276_v13, 127 }
  0xb5   :  { %v281_v29 = vsel %vm1931_vm0, %v277_v41, %v279_v24  ;;  %v284_v31 = vsel %vm1932_vm11, %v279_v24, %v273_v49  ;;  %vm1446_vm0 = vcmp.eq.s32.totalorder %v263_v22, 1  ;;  %vm1452_vm11 = vcmp.eq.s32.totalorder %v259_v27, 1  ;;  %vm1942_vm4 = vmmov %vm1941_vm2 }
  0xb6   :  { %948 = vmatprep.subr.msk.mxu1 %vm1415_vm3, %v284_v31  ;;  %v1938_v35 = vsel %vm1446_vm0, 4294967295, %v1937_v35  ;;  %v1940_v40 = vsel %vm1452_vm11, 4294967295, %v1939_v40  ;;  %v1457_v41 = vsel %vm170_vm13, 1, %v1104_v0  ;;  %vm1471_vm13 = vcmp.eq.s32.totalorder %v213_v36, 1 }
  0xb7   :  { %949 = vmatpush1.msk.msra.mxu1 %vm1423_vm8, %v281_v29  ;;  %v1944_v47 = vsel %vm1471_vm13, 4294967295, %v1943_v47  ;;  %v179_v48 = vrot.slane %v1457_v41, %v1270_v10  ;;  %v175_v52 = vrot.slane %v1457_v41, %v1273_v12  ;;  %v1954_v22 = vmov 0 }
  0xb8   :  { %v199_v38 = vpop.permute.xlu0 %198  ;;  %v241_v39 = vpop.permute.xlu1 %240 }
  0xb9   :  { %v207_v42 = vsel %vm1884_vm12, %v197_v25, %v199_v38  ;;  %v243_v43 = vsel %vm1941_vm2, %v239_v58, %v241_v39  ;;  %v246_v44 = vsel %vm1942_vm4, %v241_v39, %v235_v9  ;;  %vm1945_vm2 = vcmp.ge.s32.totalorder %v1262_v6, 1 }
  0xba   :  { %935 = vmatprep.subr.msk.mxu0 %vm1442_vm1, %v207_v42  ;;  %950 = vmatprep.subr.msk.mxu1 %vm1446_vm0, %v246_v44  ;;  %v1482_v53 = vsel %vm1945_vm2, 1, %v1104_v0  ;;  %vm1889_vm4 = vcmp.lt.s32.totalorder %v1276_v13, 15  ;;  %vm1497_vm2 = vcmp.eq.s32.totalorder %v175_v52, 1  ;;  %vm1951_vm0 = vcmp.ge.s32.totalorder %v1262_v6, 1 }
  0xbb   :  { %951 = vmatpush1.msk.msra.mxu1 %vm1452_vm11, %v243_v43  ;;  %vm1491_vm11 = vcmp.eq.s32.totalorder %v179_v48, 1  ;;  %v140_v57 = vrot.slane %v1482_v53, %v1270_v10  ;;  %v1949_v60 = vsel %vm1497_vm2, 4294967295, %v1948_v60  ;;  %vm1890_vm1 = vcmp.lt.s32.totalorder %v1276_v13, 16 }
  0xbc   :  { %v203_v49 = vpop.permute.xlu0 %202  ;;  %v158_v51 = vpop.permute.xlu1 %157  ;;  %486 = vmatprep.subr.mxu1 %v1210_v4  ;;  %v1947_v56 = vsel %vm1491_vm11, 4294967295, %v1946_v56  ;;  %v1952_v9 = vmov 0  ;;  %v136_v14 = vrot.slane %v1482_v53, %v1273_v12  ;;  %v187_v39 = vrot.slane %v1457_v41, %v1312_v30 }
  0xbd   :  { %v208_v55 = vsel %vm1884_vm12, %v203_v49, %v197_v25  ;;  %487 = vmatpush1.msra.mxu1 %v1193_v3  ;;  %vm1950_vm12 = vcmp.ge.s32.totalorder %v1264_v7, 1  ;;  %vm1514_vm8 = vcmp.eq.s32.totalorder %v140_v57, 1  ;;  %v225_v7 = vrot.slane %v1400_v15, %v1312_v30  ;;  %v388_v57 = vld [vmem:[%s1865_s3] sm:$0xff] }
  0xbe   :  { %936 = vmatpush1.msk.msra.mxu0 %vm1471_vm13, %v208_v55  ;;  %vm93_vm13 = vmand %vm1951_vm0, %vm1950_vm12  ;;  %v1953_v9 = vsel %vm1514_vm8, 4294967295, %v1952_v9  ;;  %vm1529_vm12 = vcmp.eq.s32.totalorder %v136_v14, 1  ;;  %v183_v44 = vrot.slane %v1457_v41, %v1318_v34  ;;  %v1969_v41 = vmov 0 }
  0xbf   :  { %v94_v18 = vsel %vm93_vm13, 1, %v1104_v0  ;;  %v1955_v22 = vsel %vm1529_vm12, 4294967295, %v1954_v22  ;;  %vm1533_vm0 = vcmp.eq.s32.totalorder %v225_v7, 1  ;;  %v1958_v0 = vmov 0 }
  0xc0   :  { %v160_v58 = vpop.permute.xlu0 %159  ;;  %v164_v59 = vpop.permute.xlu1 %163  ;;  %v102_v25 = vrot.slane %v94_v18, %v1270_v10  ;;  %vm1960_vm13 = vcmp.lt.s32.totalorder %v1276_v13, 1  ;;  %v1963_v10 = vmov 0 }
  0xc1   :  { %v168_v63 = vsel %vm1889_vm4, %v158_v51, %v160_v58  ;;  %v169_v8 = vsel %vm1889_vm4, %v164_v59, %v158_v51  ;;  %vm1538_vm4 = vcmp.eq.s32.totalorder %v221_v17, 1  ;;  %v148_v51 = vrot.slane %v1482_v53, %v1312_v30 }
  0xc2   :  { %937 = vmatprep.subr.msk.mxu0 %vm1491_vm11, %v168_v63  ;;  %v1959_v0 = vsel %vm1538_vm4, 4294967295, %v1958_v0  ;;  %vm1555_vm11 = vcmp.eq.s32.totalorder %v102_v25, 1  ;;  %v144_v63 = vrot.slane %v1482_v53, %v1318_v34  ;;  %v106_v17 = vrot.slane %v94_v18, %v1318_v34 }
  0xc3   :  { %938 = vmatpush1.msk.msra.mxu0 %vm1497_vm2, %v169_v8  ;;  %vm1894_vm2 = vcmp.lt.s32.totalorder %v1276_v13, 17  ;;  %v1964_v10 = vsel %vm1555_vm11, 4294967295, %v1963_v10  ;;  %v1982_v25 = vmov 0 }
  0xc4   :  { %v120_v6 = vpop.permute.xlu0 %119  ;;  %v122_v16 = vpop.permute.xlu1 %121 }
  0xc5   :  { %v130_v21 = vsel %vm1890_vm1, %v120_v6, %v122_v16  ;;  %vm1961_vm1 = vmmov %vm1960_vm13 }
  0xc6   :  { %939 = vmatprep.subr.msk.mxu0 %vm1514_vm8, %v130_v21  ;;  %vm1962_vm8 = vcmp.lt.s32.totalorder %v1276_v13, 16 }
  0xc8   :  { %v201_v27 = vpop.permute.xlu0 %200  ;;  %v126_v15 = vpop.permute.xlu1 %125 }
  0xc9   :  { %v205_v29 = vsel %vm1960_vm13, %v201_v27, %v203_v49  ;;  %v206_v31 = vsel %vm1961_vm1, %v199_v38, %v201_v27  ;;  %v131_v36 = vsel %vm1962_vm8, %v126_v15, %v120_v6  ;;  %v98_v38 = vrot.slane %v94_v18, %v1273_v12 }
  0xca   :  { %940 = vmatpush1.msk.msra.mxu0 %vm1529_vm12, %v131_v36  ;;  %952 = vmatprep.subr.msk.mxu1 %vm1533_vm0, %v205_v29  ;;  %v1965_v49 = vmov 0  ;;  %vm1572_vm8 = vcmp.eq.s32.totalorder %v187_v39, 1  ;;  %v1967_v12 = vmov 0  ;;  %vm1578_vm13 = vcmp.eq.s32.totalorder %v183_v44, 1 }
  0xcb   :  { %953 = vmatpush1.msk.msra.mxu1 %vm1538_vm4, %v206_v31  ;;  %vm1568_vm1 = vcmp.eq.s32.totalorder %v98_v38, 1  ;;  %v1968_v12 = vsel %vm1572_vm8, 4294967295, %v1967_v12  ;;  %v1970_v41 = vsel %vm1578_vm13, 4294967295, %v1969_v41  ;;  %vm1973_vm4 = vcmp.lt.s32.totalorder %v1276_v13, 17 }
  0xcc   :  { %v79_v42 = vpop.permute.xlu0 %78  ;;  %v81_v43 = vpop.permute.xlu1 %80  ;;  %v1966_v49 = vsel %vm1568_vm1, 4294967295, %v1965_v49  ;;  %v110_v6 = vrot.slane %v94_v18, %v1312_v30 }
  0xcd   :  { %v91_v48 = vsel %vm1894_vm2, %v79_v42, %v81_v43  ;;  %vm1900_vm2 = vcmask 588800  }
  0xce   :  { %941 = vmatprep.subr.msk.mxu0 %vm1555_vm11, %v91_v48  ;;  %vm1971_vm11 = vcmp.lt.s32.totalorder %v1276_v13, 15 }
  0xcf   :  { %vm1972_vm12 = vmmov %vm1971_vm11 }
  0xd0   :  { %v162_v52 = vpop.permute.xlu0 %161  ;;  %v85_v55 = vpop.permute.xlu1 %84 }
  0xd1   :  { %v166_v8 = vsel %vm1971_vm11, %v162_v52, %v164_v59  ;;  %v167_v14 = vsel %vm1972_vm12, %v160_v58, %v162_v52  ;;  %v92_v7 = vsel %vm1973_vm4, %v85_v55, %v79_v42  ;;  %vm1602_vm11 = vcmp.eq.s32.totalorder %v148_v51, 1 }
  0xd2   :  { %942 = vmatpush1.msk.msra.mxu0 %vm1568_vm1, %v92_v7  ;;  %954 = vmatprep.subr.msk.mxu1 %vm1572_vm8, %v166_v8  ;;  %vm1606_vm4 = vcmp.eq.s32.totalorder %v144_v63, 1  ;;  %vm1978_vm12 = vcmp.lt.s32.totalorder %v1276_v13, 16  ;;  %vm1984_vm8 = vcmp.lt.s32.totalorder %v1276_v13, 17 }
  0xd3   :  { %955 = vmatpush1.msk.msra.mxu1 %vm1578_vm13, %v167_v14  ;;  %943 = vmatmul.mubr.msk.f32.vlgmr.msra.gmra.mxu0 %vm1900_vm2, %v388_v57  ;;  %vm1979_vm1 = vmmov %vm1978_vm12  ;;  %vm1615_vm13 = vcmp.eq.s32.totalorder %v110_v6, 1  ;;  %vm1621_vm2 = vcmp.eq.s32.totalorder %v106_v17, 1  ;;  %v568_v17 = vld [vmem:[%s1867_s5] sm:$0xff] }
  0xd4   :  { %v124_v58 = vpop.permute.xlu0 %123  ;;  %v83_v59 = vpop.permute.xlu1 %82  ;;  %778 = vmatprep.mubr.f32.mxu0 %v1112_v5  ;;  %v1983_v25 = vsel %vm1621_vm2, 4294967295, %v1982_v25 }
  0xd5   :  { %v128_v34 = vsel %vm1978_vm12, %v124_v58, %v126_v15  ;;  %v129_v18 = vsel %vm1979_vm1, %v122_v16, %v124_v58  ;;  %v89_v27 = vsel %vm1984_vm8, %v83_v59, %v85_v55  ;;  %vm1985_vm12 = vmmov %vm1984_vm8  ;;  %vm1986_vm1 = vcmask 588800  }
  0xd6   :  { %956 = vmatprep.subr.msk.mxu1 %vm1602_vm11, %v128_v34  ;;  %v90_v16 = vsel %vm1985_vm12, %v81_v43, %v83_v59  ;;  %vm1987_vm8 = vcmp.lt.s32.totalorder %v1276_v13, 111 }
  0xd7   :  { %957 = vmatpush1.msk.msra.mxu1 %vm1606_vm4, %v129_v18  ;;  %v557_v18 = vld [vmem:[%s1866_s4] sm:$0xff]  ;;  %vm1988_vm12 = vmmov %vm1987_vm8 }
  0xd8   :  { %958 = vmatprep.subr.msk.mxu1 %vm1615_vm13, %v89_v27 }
  0xd9   :  { %959 = vmatpush1.msk.msra.mxu1 %vm1621_vm2, %v90_v16 }
  0xda   :  { %960 = vmatmul.mubr.msk.f32.vlgmr.msra.gmra.mxu1 %vm1986_vm1, %v388_v57  ;;  %vm1989_vm1 = vmmov %vm1987_vm8 }
  0xdb   :  { %849 = vmatprep.mubr.f32.mxu1 %v1112_v5  ;;  %vm1990_vm2 = vmmov %vm1989_vm1 }
 0x193   :  { %v459_v15 = vpop.f32.mrf.mxu0 }
 0x195   :  { %v461_v29 = vpop.f32.mrf.mxu0 }
 0x196   :  { %v535_v31 = vadd.f32 %v461_v29, %v459_v15 }
 0x19a   :  { %v530_v36 = vpop.f32.mrf.mxu1 }
 0x19b   :  { %v536_v38 = vadd.f32 %v535_v31, %v530_v36 }
 0x19c   :  { %v532_v39 = vpop.f32.mrf.mxu1 }
 0x19d   :  { %v537_v42 = vadd.f32 %v536_v38, %v532_v39 }
 0x19f   :  { %538 = vadd.xlane.f32.xlu0 %v537_v42 }
 0x228   :  { %v539_v44 = vpop.xlane.xlu0 %538 }
 0x229   :  { %v540_v43 = vmul.f32 0.001953125, %v539_v44 }
 0x22b   :  { %v541_v48 = vsub.f32 %v459_v15, %v540_v43  ;;  %v542_v51 = vsub.f32 %v461_v29, %v540_v43  ;;  %v543_v52 = vsub.f32 %v530_v36, %v540_v43  ;;  %v544_v55 = vsub.f32 %v532_v39, %v540_v43 }
 0x22d   :  { %v545_v63 = vmul.f32 %v541_v48, %v541_v48  ;;  %v546_v8 = vmul.f32 %v542_v51, %v542_v51  ;;  %v547_v14 = vmul.f32 %v543_v52, %v543_v52  ;;  %v548_v7 = vmul.f32 %v544_v55, %v544_v55 }
 0x22f   :  { %v549_v57 = vadd.f32 %v546_v8, %v545_v63 }
 0x231   :  { %v550_v5 = vadd.f32 %v549_v57, %v547_v14 }
 0x233   :  { %v551_v6 = vadd.f32 %v550_v5, %v548_v7 }
 0x235   :  { %552 = vadd.xlane.f32.xlu1 %v551_v6 }
 0x246   :  { %571 = vperm.xlu1 %1010, %v568_v17  }
 0x2be   :  { %v553_v58 = vpop.xlane.xlu1 %552 }
 0x2bf   :  { %v554_v59 = vmul.f32 0.001953125, %v553_v58 }
 0x2c1   :  { %v555_v34 = vadd.f32 1e-05, %v554_v59 }
 0x2c2   :  { %v572_v29 = vpop.permute.xlu1 %571 }
 0x2c3   :  { %1011 = vrsqrt.f32 %v555_v34 }
 0x2d0   :  { %v1012_v27 = vpop.eup %1011 }
 0x2d1   :  { %v558_v16 = vmul.f32 %v1012_v27, %v557_v18 }
 0x2d3   :  { %561 = vperm.xlu0 %1009, %v558_v16  }
 0x34e   :  { %v562_v15 = vpop.permute.xlu0 %561 }
 0x34f   :  { %v565_v31 = vmul.f32 %v562_v15, %v542_v51  ;;  %v566_v36 = vmul.f32 %v562_v15, %v543_v52  ;;  %v567_v38 = vmul.f32 %v562_v15, %v544_v55  ;;  %v564_v42 = vmul.f32 %v562_v15, %v541_v48 }
 0x351   :  { %v575_v39 = vadd.f32 %v572_v29, %v565_v31  ;;  %v576_v44 = vadd.f32 %v572_v29, %v566_v36  ;;  %v577_v43 = vadd.f32 %v572_v29, %v567_v38  ;;  %v574_v8 = vadd.f32 %v572_v29, %v564_v42 }
 0x353   :  { %v1643_v63 = vmax.f32 %v575_v39, 0.0  ;;  %v1649_v14 = vmax.f32 %v576_v44, 0.0  ;;  %v1651_v57 = vmax.f32 %v577_v43, 0.0  ;;  %v1657_v48 = vmax.f32 %v574_v8, 0.0 }
 0x355   :  { %664 = vrot.lane.b32.xlu0 %v1643_v63, %s1107_s29  ;;  %696 = vrot.lane.b32.xlu1 %v1643_v63, %s1105_s6 }
 0x359   :  { %700 = vrot.lane.b32.xlu0 %v1651_v57, %s1105_s6  ;;  %698 = vrot.lane.b32.xlu1 %v1649_v14, %s1105_s6 }
 0x35d   :  { %648 = vrot.lane.b32.xlu0 %v1643_v63, %s1108_s11  ;;  %694 = vrot.lane.b32.xlu1 %v1657_v48, %s1105_s6 }
 0x361   :  { %684 = vrot.lane.b32.xlu0 %v1651_v57, %s1106_s28  ;;  %680 = vrot.lane.b32.xlu1 %v1643_v63, %s1106_s28 }
 0x365   :  { %668 = vrot.lane.b32.xlu0 %v1651_v57, %s1107_s29  ;;  %682 = vrot.lane.b32.xlu1 %v1649_v14, %s1106_s28 }
 0x369   :  { %632 = vrot.lane.b32.xlu0 %v1643_v63, %s1109_s2  ;;  %678 = vrot.lane.b32.xlu1 %v1657_v48, %s1106_s28 }
 0x36d   :  { %636 = vrot.lane.b32.xlu0 %v1651_v57, %s1109_s2  ;;  %666 = vrot.lane.b32.xlu1 %v1649_v14, %s1107_s29 }
 0x371   :  { %616 = vrot.lane.b32.xlu0 %v1643_v63, %s1110_s12  ;;  %662 = vrot.lane.b32.xlu1 %v1657_v48, %s1107_s29 }
 0x375   :  { %598 = vrot.lane.b32.xlu0 %v1657_v48, %s1111_s13  ;;  %650 = vrot.lane.b32.xlu1 %v1649_v14, %s1108_s11 }
 0x379   :  { %634 = vrot.lane.b32.xlu0 %v1649_v14, %s1109_s2  ;;  %646 = vrot.lane.b32.xlu1 %v1657_v48, %s1108_s11 }
 0x37d   :  { %582 = vrot.lane.b32.xlu0 %v1657_v48, %s1113_s14  ;;  %630 = vrot.lane.b32.xlu1 %v1657_v48, %s1109_s2 }
 0x381   :  { %618 = vrot.lane.b32.xlu0 %v1649_v14, %s1110_s12  ;;  %652 = vrot.lane.b32.xlu1 %v1651_v57, %s1108_s11 }
 0x385   :  { %602 = vrot.lane.b32.xlu0 %v1649_v14, %s1111_s13  ;;  %614 = vrot.lane.b32.xlu1 %v1657_v48, %s1110_s12 }
 0x389   :  { %620 = vrot.lane.b32.xlu1 %v1651_v57, %s1110_s12 }
 0x38d   :  { %600 = vrot.lane.b32.xlu1 %v1643_v63, %s1111_s13 }
 0x391   :  { %604 = vrot.lane.b32.xlu1 %v1651_v57, %s1111_s13 }
 0x395   :  { %584 = vrot.lane.b32.xlu1 %v1643_v63, %s1113_s14 }
 0x399   :  { %588 = vrot.lane.b32.xlu1 %v1651_v57, %s1113_s14 }
 0x39d   :  { %586 = vrot.lane.b32.xlu1 %v1649_v14, %s1113_s14 }
 0x3c7   :  { %v665_v51 = vpop.permute.xlu0 %664  ;;  %v697_v52 = vpop.permute.xlu1 %696 }
 0x3cb   :  { %v701_v55 = vpop.permute.xlu0 %700  ;;  %v699_v7 = vpop.permute.xlu1 %698 }
 0x3cc   :  { %v703_v5 = vsel %vm1987_vm8, %v697_v52, %v699_v7  ;;  %v702_v34 = vsel %vm1990_vm2, %v699_v7, %v701_v55  ;;  %vm1995_vm2 = vnez %v1926_v11  ;;  %vm1997_vm8 = vnez %v1912_v37 }
 0x3cd   :  { %961 = vmatprep.subr.msk.mxu0 %vm1284_vm6, %v703_v5  ;;  %vm1991_vm6 = vcmp.lt.s32.totalorder %v1276_v13, 112 }
 0x3cf   :  { %v649_v6 = vpop.permute.xlu0 %648  ;;  %v695_v17 = vpop.permute.xlu1 %694 }
 0x3d0   :  { %v704_v58 = vsel %vm1988_vm12, %v695_v17, %v697_v52  ;;  %v705_v59 = vsel %vm1989_vm1, %v701_v55, %v695_v17  ;;  %vm2001_vm1 = vnez %v1914_v45 }
 0x3d1   :  { %962 = vmatpush1.msk.msra.mxu0 %vm1289_vm7, %v704_v58  ;;  %978 = vmatprep.subr.msk.mxu1 %vm1348_vm14, %v705_v59  ;;  %vm1992_vm7 = vmmov %vm1991_vm6  ;;  %v710_v59 = vld [vmem:[#allocation7] sm:$0xff] }
 0x3d2   :  { %979 = vmatpush1.msk.msra.mxu1 %vm1353_vm15, %v702_v34  ;;  %vm1993_vm14 = vmmov %vm1991_vm6 }
 0x3d3   :  { %v685_v19 = vpop.permute.xlu0 %684  ;;  %v681_v18 = vpop.permute.xlu1 %680  ;;  %vm1994_vm15 = vmmov %vm1991_vm6 }
 0x3d7   :  { %v669_v27 = vpop.permute.xlu0 %668  ;;  %v683_v16 = vpop.permute.xlu1 %682 }
 0x3d8   :  { %v687_v15 = vsel %vm1991_vm6, %v681_v18, %v683_v16  ;;  %v686_v50 = vsel %vm1994_vm15, %v683_v16, %v685_v19  ;;  %vm2002_vm6 = vnez %v1930_v26 }
 0x3d9   :  { %963 = vmatprep.subr.msk.mxu0 %vm1306_vm9, %v687_v15  ;;  %vm1996_vm9 = vcmp.lt.s32.totalorder %v1276_v13, 113 }
 0x3da   :  { %vm1998_vm12 = vmmov %vm1996_vm9 }
 0x3db   :  { %v633_v29 = vpop.permute.xlu0 %632  ;;  %v679_v31 = vpop.permute.xlu1 %678 }
 0x3dc   :  { %v688_v23 = vsel %vm1992_vm7, %v679_v31, %v681_v18  ;;  %v689_v46 = vsel %vm1993_vm14, %v685_v19, %v679_v31  ;;  %vm2003_vm7 = vcmp.lt.s32.totalorder %v1276_v13, 127  ;;  %vm2004_vm14 = vnez %v1920_v54 }
 0x3dd   :  { %964 = vmatpush1.msk.msra.mxu0 %vm1314_vm10, %v688_v23  ;;  %980 = vmatprep.subr.msk.mxu1 %vm1385_vm5, %v689_v46  ;;  %vm1999_vm10 = vmmov %vm1996_vm9 }
 0x3de   :  { %981 = vmatpush1.msk.msra.mxu1 %vm1995_vm2, %v686_v50  ;;  %vm2000_vm5 = vmmov %vm1996_vm9  ;;  %vm2006_vm2 = vnez %v1922_v61 }
 0x3df   :  { %v637_v28 = vpop.permute.xlu0 %636  ;;  %v667_v36 = vpop.permute.xlu1 %666  ;;  %vm2005_vm15 = vmmov %vm2003_vm7 }
 0x3e0   :  { %v671_v38 = vsel %vm1996_vm9, %v665_v51, %v667_v36  ;;  %v670_v11 = vsel %vm2000_vm5, %v667_v36, %v669_v27  ;;  %vm2012_vm5 = vmmov %vm2003_vm7 }
 0x3e1   :  { %965 = vmatprep.subr.msk.mxu0 %vm1997_vm8, %v671_v38  ;;  %vm2009_vm8 = vnez %v1936_v32 }
 0x3e3   :  { %v617_v39 = vpop.permute.xlu0 %616  ;;  %v663_v42 = vpop.permute.xlu1 %662 }
 0x3e4   :  { %v672_v33 = vsel %vm1998_vm12, %v663_v42, %v665_v51  ;;  %v673_v62 = vsel %vm1999_vm10, %v669_v27, %v663_v42  ;;  %vm2010_vm12 = vnez %v1944_v47  ;;  %vm2011_vm10 = vmmov %vm2003_vm7 }
 0x3e5   :  { %966 = vmatpush1.msk.msra.mxu0 %vm2001_vm1, %v672_v33  ;;  %982 = vmatprep.subr.msk.mxu1 %vm1415_vm3, %v673_v62  ;;  %vm2007_vm3 = vcmp.lt.s32.totalorder %v1276_v13, 1  ;;  %vm2013_vm1 = vnez %v1938_v35  ;;  %v889_v33 = vld [vmem:[%s1870_s8] sm:$0xff]  ;;  %s1114_s8 = smov [#allocation8]  }
 0x3e6   :  { %983 = vmatpush1.msk.msra.mxu1 %vm2002_vm6, %v670_v11  ;;  %vm2008_vm9 = vmmov %vm2007_vm3  ;;  %vm2014_vm6 = vnez %v1940_v40  ;;  %s917_s1 = sshll.u32 %s1114_s8, 4  ;;  %s918_s1 = int_to_ptr.vmem [resolvable:$true] %s917_s1 }
 0x3e7   :  { %v651_v37 = vpop.permute.xlu1 %650  ;;  %v599_v44 = vpop.permute.xlu0 %598  ;;  %p1080_p2 = scmp.lt.s32.totalorder %s918_s1, %s918_s1 }
 0x3e8   :  { %v655_v43 = vsel %vm2003_vm7, %v649_v6, %v651_v37  ;;  %vm2015_vm7 = vmmov %vm2007_vm3 }
 0x3e9   :  { %967 = vmatprep.subr.msk.mxu0 %vm2004_vm14, %v655_v43  ;;  %vm2016_vm14 = vcmp.lt.s32.totalorder %v1276_v13, 15 }
 0x3eb   :  { %v647_v8 = vpop.permute.xlu1 %646  ;;  %v635_v45 = vpop.permute.xlu0 %634 }
 0x3ec   :  { %v656_v51 = vsel %vm2005_vm15, %v647_v8, %v649_v6  ;;  %v638_v47 = vsel %vm2015_vm7, %v635_v45, %v637_v28  ;;  %vm2017_vm15 = vmmov %vm2007_vm3 }
 0x3ed   :  { %968 = vmatpush1.msk.msra.mxu0 %vm2006_vm2, %v656_v51  ;;  %v639_v7 = vsel %vm2017_vm15, %v633_v29, %v635_v45  ;;  %vm2018_vm2 = vnez %v1947_v56 }
 0x3ee   :  { %736 = vmatprep.subr.mxu0 %v1643_v63 }
 0x3ef   :  { %737 = vmatpush1.msra.mxu0 %v1657_v48  ;;  %v631_v20 = vpop.permute.xlu1 %630  ;;  %v583_v52 = vpop.permute.xlu0 %582 }
 0x3f0   :  { %v640_v26 = vsel %vm2007_vm3, %v631_v20, %v633_v29  ;;  %v641_v54 = vsel %vm2008_vm9, %v637_v28, %v631_v20  ;;  %vm2019_vm3 = vnez %v1959_v0  ;;  %vm2020_vm9 = vmmov %vm2016_vm14 }
 0x3f1   :  { %969 = vmatprep.subr.msk.mxu0 %vm2009_vm8, %v640_v26  ;;  %vm2021_vm8 = vmmov %vm2020_vm9 }
 0x3f2   :  { %970 = vmatpush1.msk.msra.mxu0 %vm2010_vm12, %v641_v54  ;;  %vm2022_vm12 = vmmov %vm2021_vm8 }
 0x3f3   :  { %v653_v61 = vpop.permute.xlu1 %652  ;;  %v619_v35 = vpop.permute.xlu0 %618 }
 0x3f4   :  { %v654_v63 = vsel %vm2011_vm10, %v651_v37, %v653_v61  ;;  %v657_v48 = vsel %vm2012_vm5, %v653_v61, %v647_v8  ;;  %v623_v5 = vsel %vm2022_vm12, %v617_v39, %v619_v35  ;;  %vm2023_vm10 = vnez %v1949_v60 }
 0x3f5   :  { %984 = vmatprep.subr.msk.mxu1 %vm2013_vm1, %v657_v48  ;;  %vm2024_vm5 = vnez %v1968_v12  ;;  %vm2026_vm1 = vcmp.lt.s32.totalorder %v1276_v13, 16  ;;  %vm2035_vm12 = vnez %v1966_v49 }
 0x3f6   :  { %985 = vmatpush1.msk.msra.mxu1 %vm2014_vm6, %v654_v63  ;;  %vm2027_vm6 = vnez %v1953_v9  ;;  %vm2028_vm7 = vmmov %vm2026_vm1 }
 0x3f7   :  { %807 = vmatprep.subr.mxu1 %v1651_v57  ;;  %v615_v32 = vpop.permute.xlu1 %614  ;;  %v603_v0 = vpop.permute.xlu0 %602  ;;  %vm2030_vm15 = vmmov %vm2026_vm1 }
 0x3f8   :  { %v624_v55 = vsel %vm2016_vm14, %v615_v32, %v617_v39  ;;  %808 = vmatpush1.msra.mxu1 %v1649_v14  ;;  %vm2029_vm14 = vmmov %vm2026_vm1 }
 0x3f9   :  { %971 = vmatprep.subr.msk.mxu0 %vm2018_vm2, %v624_v55  ;;  %986 = vmatprep.subr.msk.mxu1 %vm1533_vm0, %v638_v47  ;;  %vm2025_vm0 = vnez %v1970_v41  ;;  %vm2031_vm2 = vnez %v1955_v22 }
 0x3fa   :  { %987 = vmatpush1.msk.msra.mxu1 %vm2019_vm3, %v639_v7  ;;  %vm2032_vm3 = vcmp.lt.s32.totalorder %v1276_v13, 17 }
 0x3fb   :  { %v621_v40 = vpop.permute.xlu1 %620 }
 0x3fc   :  { %v622_v57 = vsel %vm2020_vm9, %v619_v35, %v621_v40  ;;  %v625_v14 = vsel %vm2021_vm8, %v621_v40, %v615_v32  ;;  %vm2033_vm9 = vnez %v1964_v10  ;;  %vm2034_vm8 = vmmov %vm2032_vm3 }
 0x3fd   :  { %972 = vmatpush1.msk.msra.mxu0 %vm2023_vm10, %v625_v14  ;;  %988 = vmatprep.subr.msk.mxu1 %vm2024_vm5, %v622_v57  ;;  %vm2036_vm10 = vcmask 588800   ;;  %vm2039_vm5 = vnez %v1983_v25 }
 0x3fe   :  { %989 = vmatpush1.msk.msra.mxu1 %vm2025_vm0, %v623_v5  ;;  %vm2040_vm0 = vmmov %vm2036_vm10 }
 0x3ff   :  { %v601_v56 = vpop.permute.xlu1 %600 }
 0x400   :  { %v608_v24 = vsel %vm2026_vm1, %v599_v44, %v601_v56  ;;  %v607_v12 = vsel %vm2030_vm15, %v601_v56, %v603_v0 }
 0x401   :  { %973 = vmatprep.subr.msk.mxu0 %vm2027_vm6, %v608_v24 }
 0x403   :  { %v605_v6 = vpop.permute.xlu1 %604 }
 0x404   :  { %v606_v17 = vsel %vm2028_vm7, %v603_v0, %v605_v6  ;;  %v609_v60 = vsel %vm2029_vm14, %v605_v6, %v599_v44  ;;  %v878_v44 = vld [vmem:[%s1869_s7] sm:$0xff]  ;;  %s1075_s7 = scalar_lea.vmem %s918_s1, 512 }
 0x405   :  { %974 = vmatpush1.msk.msra.mxu0 %vm2031_vm2, %v609_v60  ;;  %990 = vmatprep.subr.msk.mxu1 %vm1602_vm11, %v606_v17  ;;  %vm2037_vm11 = vmmov %vm2032_vm3  ;;  %p1076_p1 = scmp.ne.s32.totalorder %s918_s1, %s1075_s7  ;;  %p1081_p3 = scmp.lt.s32.totalorder %s1075_s7, %s1075_s7 }
 0x406   :  { %991 = vmatpush1.msk.msra.mxu1 %vm1606_vm4, %v607_v12  ;;  %vm2038_vm4 = vmmov %vm2032_vm3 }
 0x407   :  { %v585_v9 = vpop.permute.xlu1 %584  ;;  %p1082_p4 = por %p1081_p3, %p1080_p2 }
 0x408   :  { %v592_v41 = vsel %vm2032_vm3, %v583_v52, %v585_v9 }
 0x409   :  { %975 = vmatprep.subr.msk.mxu0 %vm2033_vm9, %v592_v41  ;;  %p1083_p5 = pnand %p1082_p4, %p1076_p1 }
 0x40b   :  { %v589_v58 = vpop.permute.xlu1 %588 }
 0x40c   :  { %v593_v34 = vsel %vm2034_vm8, %v589_v58, %v583_v52 }
 0x40d   :  { %976 = vmatpush1.msk.msra.mxu0 %vm2035_vm12, %v593_v34 }
 0x40e   :  { %977 = vmatmul.mubr.msk.f32.vlgmr.msra.gmra.mxu0 %vm2036_vm10, %v710_v59 }
 0x40f   :  { %v587_v22 = vpop.permute.xlu1 %586 }
 0x410   :  { %v590_v53 = vsel %vm2037_vm11, %v587_v22, %v589_v58  ;;  %v591_v30 = vsel %vm2038_vm4, %v585_v9, %v587_v22 }
 0x411   :  { %992 = vmatprep.subr.msk.mxu1 %vm1615_vm13, %v590_v53 }
 0x412   :  { %993 = vmatpush1.msk.msra.mxu1 %vm2039_vm5, %v591_v30 }
 0x413   :  { %994 = vmatmul.mubr.msk.f32.vlgmr.msra.gmra.mxu1 %vm2040_vm0, %v710_v59 }
 0x4ce   :  { %v780_v10 = vpop.f32.mrf.mxu0 }
 0x4d0   :  { %v782_v49 = vpop.f32.mrf.mxu0 }
 0x4d1   :  { %v856_v19 = vadd.f32 %v782_v49, %v780_v10 }
 0x4d3   :  { %v851_v18 = vpop.f32.mrf.mxu1 }
 0x4d4   :  { %v857_v27 = vadd.f32 %v856_v19, %v851_v18 }
 0x4d5   :  { %v853_v16 = vpop.f32.mrf.mxu1 }
 0x4d6   :  { %v858_v15 = vadd.f32 %v857_v27, %v853_v16 }
 0x4d8   :  { %859 = vadd.xlane.f32.xlu0 %v858_v15 }
 0x561   :  { %v860_v29 = vpop.xlane.xlu0 %859 }
 0x562   :  { %v861_v31 = vmul.f32 0.001953125, %v860_v29 }
 0x564   :  { %v862_v13 = vsub.f32 %v780_v10, %v861_v31  ;;  %v863_v23 = vsub.f32 %v782_v49, %v861_v31  ;;  %v864_v46 = vsub.f32 %v851_v18, %v861_v31  ;;  %v865_v21 = vsub.f32 %v853_v16, %v861_v31 }
 0x566   :  { %v866_v50 = vmul.f32 %v862_v13, %v862_v13  ;;  %v867_v28 = vmul.f32 %v863_v23, %v863_v23  ;;  %v868_v25 = vmul.f32 %v864_v46, %v864_v46  ;;  %v869_v38 = vmul.f32 %v865_v21, %v865_v21 }
 0x568   :  { %v870_v36 = vadd.f32 %v867_v28, %v866_v50 }
 0x56a   :  { %v871_v39 = vadd.f32 %v870_v36, %v868_v25 }
 0x56c   :  { %v872_v42 = vadd.f32 %v871_v39, %v869_v38 }
 0x56e   :  { %873 = vadd.xlane.f32.xlu1 %v872_v42 }
 0x57f   :  { %892 = vperm.xlu1 %1010, %v889_v33  }
 0x5f7   :  { %v874_v62 = vpop.xlane.xlu1 %873 }
 0x5f8   :  { %v875_v11 = vmul.f32 0.001953125, %v874_v62 }
 0x5fa   :  { %v876_v37 = vadd.f32 1e-05, %v875_v11 }
 0x5fb   :  { %v893_v61 = vpop.permute.xlu1 %892 }
 0x5fc   :  { %1013 = vrsqrt.f32 %v876_v37 }
 0x609   :  { %v1014_v43 = vpop.eup %1013 }
 0x60a   :  { %v879_v8 = vmul.f32 %v1014_v43, %v878_v44 }
 0x60c   :  { %882 = vperm.xlu0 %1009, %v879_v8  }
 0x687   :  { %v883_v51 = vpop.permute.xlu0 %882 }
 0x688   :  { %v885_v45 = vmul.f32 %v883_v51, %v862_v13  ;;  %v886_v20 = vmul.f32 %v883_v51, %v863_v23  ;;  %v887_v26 = vmul.f32 %v883_v51, %v864_v46  ;;  %v888_v54 = vmul.f32 %v883_v51, %v865_v21 }
 0x68a   :  { %v895_v52 = vadd.f32 %v893_v61, %v885_v45  ;;  %v896_v63 = vadd.f32 %v893_v61, %v886_v20  ;;  %v897_v48 = vadd.f32 %v893_v61, %v887_v26  ;;  %v898_v32 = vadd.f32 %v893_v61, %v888_v54 }
 0x68c   :  { %v899_v47 = vadd.f32 %v895_v52, %v1184_v2  ;;  %v900_v55 = vadd.f32 %v896_v63, %v1179_v1  ;;  %v901_v7 = vadd.f32 %v897_v48, %v1193_v3  ;;  %v902_v35 = vadd.f32 %v898_v32, %v1210_v4 }
 0x68e   :  { %v903_v40 = vmax.f32 %v899_v47, 0.0  ;;  %v904_v57 = vmax.f32 %v900_v55, 0.0  ;;  %v905_v14 = vmax.f32 %v901_v7, 0.0  ;;  %v906_v5 = vmax.f32 %v902_v35, 0.0 }
 0x690   :  { %907 = vst [vmem:[#allocation8] sm:$0xff] %v903_v40  ;;  %908 = vst [vmem:[#allocation8 + $0x8] sm:$0xff] %v904_v57 }
 0x691   :  { %909 = vst [vmem:[#allocation8 + $0x10] sm:$0xff] %v905_v14  ;;  %910 = vst [vmem:[#allocation8 + $0x18] sm:$0xff] %v906_v5 }
 0x692   :  { %1086 = shalt.err (!%p1083_p5)
}
 0x693   :  { %920 = dma.vmem_to_hbm [thread:$0]  %s918_s1, 512, %s1871_s9, [#allocation4]  }
 0x694   :  { %1099 = dma.done.wait [#allocation4], 512  }
 0x695   :  { %1100 = vsyncadd [#allocation4], 4294966784 }
 0x696   :  { %924 = vsyncpa [#allocation3], 1 }
 0x697   :  { %925 = vsyncpa [#allocation6], 1 }
 0x698   :  { %926 = vsyncpa [#allocation4], 1 }

</bundles_post_ra>
